<compile_context>
chip_gen: v5e
topology: v5e:2x2
jax: 0.10.0
libtpu: 0.0.40
codegen_flags: <defaults>
</compile_context>

<pallas_src>
import jax
import jax.numpy as jnp
from jax import lax
from jax.experimental import pallas as pl
from jax.experimental.pallas import tpu as pltpu


def _round_up(x, m):
    return ((x + m - 1) // m) * m


def _pad_to(x, shape):
    pads = [(0, s - d) for d, s in zip(x.shape, shape)]
    return jnp.pad(x, pads)


def gru_regression_kernel(igates_ref, lastidx_ref, whh_ref, bhn_ref,
                          wlin_ref, blin_ref, out_ref, h_scr, sel_scr):
    Tc, BP, threeHP = igates_ref.shape
    HP = threeHP // 3
    c = pl.program_id(0)

    # Initialize the carried state on the first T-chunk (matches init_hidden()).
    @pl.when(c == 0)
    def _():
        h_scr[...] = jnp.zeros_like(h_scr)
        sel_scr[...] = jnp.zeros_like(sel_scr)

    whh = whh_ref[...]          # (HP, 3*HP) — loaded once per chunk, reused every step
    bhn = bhn_ref[...]          # (1, HP)    — r-gated hidden bias of the n gate
    last_idx = lastidx_ref[...]  # (BP, 1) int32
    t_base = c * Tc

    def step(t, carry):
        h_prev, sel = carry

        ig = igates_ref[t]                                    # (BP, 3*HP)
        hg = jnp.dot(h_prev, whh,
                     preferred_element_type=jnp.float32)      # (BP, 3*HP) one MXU push

        # Gate slices are whole 128-lane tiles (HP is a multiple of 128).
        i_r = ig[:, 0 * HP:1 * HP]
        i_z = ig[:, 1 * HP:2 * HP]
        i_n = ig[:, 2 * HP:3 * HP]
        h_r = hg[:, 0 * HP:1 * HP]
        h_z = hg[:, 1 * HP:2 * HP]
        h_n = hg[:, 2 * HP:3 * HP] + bhn

        r = jax.nn.sigmoid(i_r + h_r)
        z = jax.nn.sigmoid(i_z + h_z)
        n = jnp.tanh(i_n + r * h_n)          # PyTorch GRU: r gates the hidden term
        h_new = (1.0 - z) * n + z * h_prev

        # torch.gather(gru_out, 1, last_words - 1): capture h_t where t == last_idx[b]
        sel = jnp.where(last_idx == (t_base + t), h_new, sel)
        return h_new, sel

    h, sel = lax.fori_loop(0, Tc, step, (h_scr[...], sel_scr[...]),
                           unroll=min(4, Tc))
    h_scr[...] = h
    sel_scr[...] = sel

    # Final Linear on the gathered hidden state, only on the last chunk.
    @pl.when(c == pl.num_programs(0) - 1)
    def _():
        out_ref[...] = (jnp.dot(sel, wlin_ref[...],
                                preferred_element_type=jnp.float32) + blin_ref[...])


def gru_regression_forward(text_input, last_words, params, *, t_chunk=None):
    emb_table = params["embedding"]                            # (V, E)
    B, T = text_input.shape
    E = emb_table.shape[1]
    H = params["w_hh"].shape[-1]
    F = params["w_lin"].shape[-1]

    HP = _round_up(H, 128)     # lane-tile-aligned per-gate width
    FP = _round_up(F, 128)     # lane-dense output width
    BP = _round_up(B, 8)       # sublane-aligned batch

    f32 = jnp.float32
    # Per-gate padded weights, concatenated [r | z | n]; each gate block is a
    # whole multiple of 128 lanes.  Padded lanes of h provably stay zero.
    w_ih_cat = jnp.concatenate(
        [_pad_to(params["w_ih"][g].astype(f32), (E, HP)) for g in range(3)], axis=-1)   # (E, 3HP)
    w_hh_cat = jnp.concatenate(
        [_pad_to(params["w_hh"][g].astype(f32), (HP, HP)) for g in range(3)], axis=-1)  # (HP, 3HP)
    b_cat = jnp.concatenate(
        [_pad_to((params["b_ih"][0] + params["b_hh"][0]).astype(f32), (1, HP)),
         _pad_to((params["b_ih"][1] + params["b_hh"][1]).astype(f32), (1, HP)),
         _pad_to(params["b_ih"][2].astype(f32), (1, HP))], axis=-1)                     # (1, 3HP)
    b_hn = _pad_to(params["b_hh"][2].astype(f32), (1, HP))                              # (1, HP)
    w_lin = _pad_to(params["w_lin"].astype(f32), (HP, FP))                              # (HP, FP)
    b_lin = _pad_to(params["b_lin"].astype(f32), (1, FP))                               # (1, FP)

    # Time-major embedding gather: avoids a standalone transpose of the big
    # activation stream (only the tiny int32 index array is transposed).
    embeds_tm = jnp.take(emb_table, text_input.T, axis=0).astype(f32)         # (T, B, E)
    i_gates = (embeds_tm.reshape(T * B, E) @ w_ih_cat + b_cat).reshape(T, B, 3 * HP)
    i_gates = _pad_to(i_gates, (T, BP, 3 * HP))                               # (T, BP, 3HP)

    # Clamp to [0, T-1] so out-of-range last_words cannot silently zero the output.
    last_idx = jnp.clip(last_words.astype(jnp.int32) - 1, 0, T - 1).reshape(B, 1)
    last_idx = _pad_to(last_idx, (BP, 1))                                     # (BP, 1)

    # Size the T-chunk so the double-buffered i_gates stream stays well inside a
    # 48 MiB VMEM limit (safe on v7x's 64 MiB physical VMEM as well as v5e/v6e).
    if t_chunk is None:
        per_step_bytes = BP * 3 * HP * 4
        t_chunk = max(1, (16 * 1024 * 1024) // per_step_bytes)   # 16 MiB/buffer x2
    tc = max(d for d in range(1, T + 1) if T % d == 0 and d <= t_chunk)
    n_chunks = T // tc

    out_padded = pl.pallas_call(
        gru_regression_kernel,
        out_shape=jax.ShapeDtypeStruct((BP, FP), jnp.float32),
        grid_spec=pltpu.PrefetchScalarGridSpec(
            num_scalar_prefetch=0,
            grid=(n_chunks,),
            in_specs=[
                pl.BlockSpec((tc, BP, 3 * HP), lambda c: (c, 0, 0)),  # streamed i_gates
                pl.BlockSpec((BP, 1), lambda c: (0, 0)),              # last_idx
                pl.BlockSpec((HP, 3 * HP), lambda c: (0, 0)),         # W_hh_cat
                pl.BlockSpec((1, HP), lambda c: (0, 0)),              # b_hn
                pl.BlockSpec((HP, FP), lambda c: (0, 0)),             # W_lin
                pl.BlockSpec((1, FP), lambda c: (0, 0)),              # b_lin
            ],
            out_specs=pl.BlockSpec((BP, FP), lambda c: (0, 0)),
            scratch_shapes=[pltpu.VMEM((BP, HP), jnp.float32),        # h carry
                            pltpu.VMEM((BP, HP), jnp.float32)],       # sel carry
        ),
        compiler_params=pltpu.CompilerParams(
            dimension_semantics=("arbitrary",),
            vmem_limit_bytes=48 * 1024 * 1024,
        ),
    )(i_gates, last_idx, w_hh_cat, b_hn, w_lin, b_lin)

    return out_padded[:B, :F]


def gru_regression_reference(text_input, last_words, params):
    """Pure-JAX reference mirroring the PyTorch forward (for verification)."""
    embeds = jnp.take(params["embedding"], text_input, axis=0)  # (B, T, E)
    B, T, _ = embeds.shape
    H = params["w_hh"].shape[-1]
    h = jnp.zeros((B, H), jnp.float32)
    outs = []
    for t in range(T):
        x_t = embeds[:, t, :]
        i_r = x_t @ params["w_ih"][0] + params["b_ih"][0]
        i_z = x_t @ params["w_ih"][1] + params["b_ih"][1]
        i_n = x_t @ params["w_ih"][2] + params["b_ih"][2]
        h_r = h @ params["w_hh"][0] + params["b_hh"][0]
        h_z = h @ params["w_hh"][1] + params["b_hh"][1]
        h_n = h @ params["w_hh"][2] + params["b_hh"][2]
        r = jax.nn.sigmoid(i_r + h_r)
        z = jax.nn.sigmoid(i_z + h_z)
        n = jnp.tanh(i_n + r * h_n)
        h = (1.0 - z) * n + z * h
        outs.append(h)
    gru_out = jnp.stack(outs, axis=1)                 # (B, T, H)
    idx = last_words.astype(jnp.int32) - 1
    last_out = gru_out[jnp.arange(B), idx, :]         # (B, H)
    return last_out @ params["w_lin"] + params["b_lin"]


if __name__ == "__main__":
    # small shapes implied by the module
    vocab_size = 50
    embedding_dim = 32
    hidden_size = 32
    img_feature_size = 16
    batch = 4
    seq_len = 8

    key = jax.random.PRNGKey(0)
    ks = jax.random.split(key, 10)

    params = {
        "embedding": jax.random.normal(ks[0], (vocab_size, embedding_dim), jnp.float32) * 0.1,
        "w_ih": jax.random.normal(ks[1], (3, embedding_dim, hidden_size), jnp.float32) * 0.1,
        "w_hh": jax.random.normal(ks[2], (3, hidden_size, hidden_size), jnp.float32) * 0.1,
        "b_ih": jax.random.normal(ks[3], (3, 1, hidden_size), jnp.float32) * 0.1,
        "b_hh": jax.random.normal(ks[4], (3, 1, hidden_size), jnp.float32) * 0.1,
        "w_lin": jax.random.normal(ks[5], (hidden_size, img_feature_size), jnp.float32) * 0.1,
        "b_lin": jax.random.normal(ks[6], (1, img_feature_size), jnp.float32) * 0.1,
    }

    text_input = jax.random.randint(ks[7], (batch, seq_len), 0, vocab_size, jnp.int32)
    # last_words in [1, seq_len]; forward uses index last_words - 1
    last_words = jax.random.randint(ks[8], (batch,), 1, seq_len + 1, jnp.int32)

    # t_chunk=4 forces 2 grid chunks so the streamed-carry path is exercised.
    out = gru_regression_forward(text_input, last_words, params, t_chunk=4)
    out = jax.block_until_ready(out)

    ref = gru_regression_reference(text_input, last_words, params)
    assert out.shape == (batch, img_feature_size)
    assert jnp.allclose(out, ref, atol=1e-5, rtol=1e-5), "mismatch vs reference"

    print("KERNEL_OK")
</pallas_src>

<mosaic_0001>
module attributes {stable_mosaic.version = 11 : i64} {
  func.func @gru_regression_kernel(%arg0: i32, %arg1: memref<4x8x384xf32, #tpu.memory_space<vmem>>, %arg2: memref<8x1xi32, #tpu.memory_space<vmem>>, %arg3: memref<128x384xf32, #tpu.memory_space<vmem>>, %arg4: memref<1x128xf32, #tpu.memory_space<vmem>>, %arg5: memref<128x128xf32, #tpu.memory_space<vmem>>, %arg6: memref<1x128xf32, #tpu.memory_space<vmem>>, %arg7: memref<8x128xf32, #tpu.memory_space<vmem>>, %arg8: memref<8x128xf32, #tpu.memory_space<vmem>>, %arg9: memref<8x128xf32, #tpu.memory_space<vmem>>) attributes {dimension_semantics = [#tpu.dimension_semantics<arbitrary>], iteration_bounds = array<i64: 2>, scalar_prefetch = 0 : i64, scratch_operands = 2 : i64, tpu.core_type = #tpu.core_type<tc>, window_params = [{transform_indices = @transform_0, window_bounds = array<i64: 4, 8, 384>}, {pipeline_mode = #tpu.pipeline_mode<synchronous>, transform_indices = @transform_1, window_bounds = array<i64: 8, 1>}, {pipeline_mode = #tpu.pipeline_mode<synchronous>, transform_indices = @transform_2, window_bounds = array<i64: 128, 384>}, {pipeline_mode = #tpu.pipeline_mode<synchronous>, transform_indices = @transform_3, window_bounds = array<i64: 1, 128>}, {pipeline_mode = #tpu.pipeline_mode<synchronous>, transform_indices = @transform_4, window_bounds = array<i64: 128, 128>}, {pipeline_mode = #tpu.pipeline_mode<synchronous>, transform_indices = @transform_5, window_bounds = array<i64: 1, 128>}, {pipeline_mode = #tpu.pipeline_mode<synchronous>, transform_indices = @transform_6, window_bounds = array<i64: 8, 128>}]} {
    %c0_i32 = arith.constant 0 : i32
    %0 = arith.cmpi eq, %arg0, %c0_i32 : i32
    %1 = arith.extui %0 : i1 to i32
    %c0_i32_0 = arith.constant 0 : i32
    %2 = arith.cmpi ne, %1, %c0_i32_0 : i32
    scf.if %2 {
      %cst_41 = arith.constant 0.000000e+00 : f32
      %166 = vector.broadcast %cst_41 : f32 to vector<8x128xf32>
      %c0_42 = arith.constant 0 : index
      %c0_43 = arith.constant 0 : index
      %167 = vector.load %arg8[%c0_42, %c0_43] : memref<8x128xf32, #tpu.memory_space<vmem>>, vector<8x128xf32>
      tpu.vector_store %arg8[%c0_42, %c0_43], %166 {strides = array<i32>} : memref<8x128xf32, #tpu.memory_space<vmem>>, vector<8x128xf32>,
      %cst_44 = arith.constant 0.000000e+00 : f32
      %168 = vector.broadcast %cst_44 : f32 to vector<8x128xf32>
      %c0_45 = arith.constant 0 : index
      %c0_46 = arith.constant 0 : index
      %169 = vector.load %arg9[%c0_45, %c0_46] : memref<8x128xf32, #tpu.memory_space<vmem>>, vector<8x128xf32>
      tpu.vector_store %arg9[%c0_45, %c0_46], %168 {strides = array<i32>} : memref<8x128xf32, #tpu.memory_space<vmem>>, vector<8x128xf32>,
    } else {
    }
    %c0 = arith.constant 0 : index
    %c0_1 = arith.constant 0 : index
    %3 = vector.load %arg3[%c0, %c0_1] : memref<128x384xf32, #tpu.memory_space<vmem>>, vector<128x384xf32>
    %c0_2 = arith.constant 0 : index
    %c0_3 = arith.constant 0 : index
    %4 = vector.load %arg4[%c0_2, %c0_3] : memref<1x128xf32, #tpu.memory_space<vmem>>, vector<1x128xf32>
    %c0_4 = arith.constant 0 : index
    %c0_5 = arith.constant 0 : index
    %5 = vector.load %arg2[%c0_4, %c0_5] : memref<8x1xi32, #tpu.memory_space<vmem>>, vector<8x1xi32>
    %c4_i32 = arith.constant 4 : i32
    %6 = arith.muli %arg0, %c4_i32 : i32
    %c0_6 = arith.constant 0 : index
    %c0_7 = arith.constant 0 : index
    %7 = vector.load %arg8[%c0_6, %c0_7] : memref<8x128xf32, #tpu.memory_space<vmem>>, vector<8x128xf32>
    %c0_8 = arith.constant 0 : index
    %c0_9 = arith.constant 0 : index
    %8 = vector.load %arg9[%c0_8, %c0_9] : memref<8x128xf32, #tpu.memory_space<vmem>>, vector<8x128xf32>
    %c0_i32_10 = arith.constant 0 : i32
    %9 = arith.index_cast %c0_i32_10 : i32 to index
    %c0_11 = arith.constant 0 : index
    %c0_12 = arith.constant 0 : index
    %10 = vector.load %arg1[%9, %c0_11, %c0_12] : memref<4x8x384xf32, #tpu.memory_space<vmem>>, vector<1x8x384xf32>
    %11 = vector.shape_cast %10 : vector<1x8x384xf32> to vector<8x384xf32>
    %cst = arith.constant dense<0.000000e+00> : vector<8x384xf32>
    %12 = tpu.matmul %7, %3, %cst {dimension_numbers = #tpu.dot_dimension_numbers<[1], [0], [0], [1], [0, 0, 1, 1], [], []>} : vector<8x128xf32>, vector<128x384xf32>, vector<8x384xf32> -> vector<8x384xf32>
    %13 = vector.extract_strided_slice %11 {offsets = [0, 0], sizes = [8, 128], strides = [1, 1]} : vector<8x384xf32> to vector<8x128xf32>
    %14 = vector.extract_strided_slice %11 {offsets = [0, 128], sizes = [8, 128], strides = [1, 1]} : vector<8x384xf32> to vector<8x128xf32>
    %15 = vector.extract_strided_slice %11 {offsets = [0, 256], sizes = [8, 128], strides = [1, 1]} : vector<8x384xf32> to vector<8x128xf32>
    %16 = vector.extract_strided_slice %12 {offsets = [0, 0], sizes = [8, 128], strides = [1, 1]} : vector<8x384xf32> to vector<8x128xf32>
    %17 = vector.extract_strided_slice %12 {offsets = [0, 128], sizes = [8, 128], strides = [1, 1]} : vector<8x384xf32> to vector<8x128xf32>
    %18 = vector.extract_strided_slice %12 {offsets = [0, 256], sizes = [8, 128], strides = [1, 1]} : vector<8x384xf32> to vector<8x128xf32>
    %19 = vector.broadcast %4 : vector<1x128xf32> to vector<8x128xf32>
    %20 = arith.addf %18, %19 : vector<8x128xf32>
    %21 = arith.addf %13, %16 : vector<8x128xf32>
    %22 = arith.negf %21 : vector<8x128xf32>
    %23 = math.exp %22 : vector<8x128xf32>
    %cst_13 = arith.constant 1.000000e+00 : f32
    %24 = vector.broadcast %cst_13 : f32 to vector<8x128xf32>
    %25 = arith.addf %24, %23 : vector<8x128xf32>
    %26 = arith.divf %24, %25 : vector<8x128xf32>
    %27 = arith.addf %14, %17 : vector<8x128xf32>
    %28 = arith.negf %27 : vector<8x128xf32>
    %29 = math.exp %28 : vector<8x128xf32>
    %cst_14 = arith.constant 1.000000e+00 : f32
    %30 = vector.broadcast %cst_14 : f32 to vector<8x128xf32>
    %31 = arith.addf %30, %29 : vector<8x128xf32>
    %32 = arith.divf %30, %31 : vector<8x128xf32>
    %33 = arith.mulf %26, %20 : vector<8x128xf32>
    %34 = arith.addf %15, %33 : vector<8x128xf32>
    %35 = math.tanh %34 : vector<8x128xf32>
    %cst_15 = arith.constant 1.000000e+00 : f32
    %36 = vector.broadcast %cst_15 : f32 to vector<8x128xf32>
    %37 = arith.subf %36, %32 : vector<8x128xf32>
    %38 = arith.mulf %37, %35 : vector<8x128xf32>
    %39 = arith.mulf %32, %7 : vector<8x128xf32>
    %40 = arith.addf %38, %39 : vector<8x128xf32>
    %41 = arith.addi %6, %c0_i32_10 : i32
    %42 = vector.broadcast %41 : i32 to vector<8x1xi32>
    %43 = arith.cmpi eq, %5, %42 : vector<8x1xi32>
    %44 = vector.shape_cast %43 : vector<8x1xi1> to vector<8x1xi1>
    %45 = vector.broadcast %44 : vector<8x1xi1> to vector<8x128xi1>
    %46 = arith.select %45, %40, %8 : vector<8x128xi1>, vector<8x128xf32>
    %c1_i32 = arith.constant 1 : i32
    %47 = arith.index_cast %c1_i32 : i32 to index
    %c0_16 = arith.constant 0 : index
    %c0_17 = arith.constant 0 : index
    %48 = vector.load %arg1[%47, %c0_16, %c0_17] : memref<4x8x384xf32, #tpu.memory_space<vmem>>, vector<1x8x384xf32>
    %49 = vector.shape_cast %48 : vector<1x8x384xf32> to vector<8x384xf32>
    %cst_18 = arith.constant dense<0.000000e+00> : vector<8x384xf32>
    %50 = tpu.matmul %40, %3, %cst_18 {dimension_numbers = #tpu.dot_dimension_numbers<[1], [0], [0], [1], [0, 0, 1, 1], [], []>} : vector<8x128xf32>, vector<128x384xf32>, vector<8x384xf32> -> vector<8x384xf32>
    %51 = vector.extract_strided_slice %49 {offsets = [0, 0], sizes = [8, 128], strides = [1, 1]} : vector<8x384xf32> to vector<8x128xf32>
    %52 = vector.extract_strided_slice %49 {offsets = [0, 128], sizes = [8, 128], strides = [1, 1]} : vector<8x384xf32> to vector<8x128xf32>
    %53 = vector.extract_strided_slice %49 {offsets = [0, 256], sizes = [8, 128], strides = [1, 1]} : vector<8x384xf32> to vector<8x128xf32>
    %54 = vector.extract_strided_slice %50 {offsets = [0, 0], sizes = [8, 128], strides = [1, 1]} : vector<8x384xf32> to vector<8x128xf32>
    %55 = vector.extract_strided_slice %50 {offsets = [0, 128], sizes = [8, 128], strides = [1, 1]} : vector<8x384xf32> to vector<8x128xf32>
    %56 = vector.extract_strided_slice %50 {offsets = [0, 256], sizes = [8, 128], strides = [1, 1]} : vector<8x384xf32> to vector<8x128xf32>
    %57 = vector.broadcast %4 : vector<1x128xf32> to vector<8x128xf32>
    %58 = arith.addf %56, %57 : vector<8x128xf32>
    %59 = arith.addf %51, %54 : vector<8x128xf32>
    %60 = arith.negf %59 : vector<8x128xf32>
    %61 = math.exp %60 : vector<8x128xf32>
    %cst_19 = arith.constant 1.000000e+00 : f32
    %62 = vector.broadcast %cst_19 : f32 to vector<8x128xf32>
    %63 = arith.addf %62, %61 : vector<8x128xf32>
    %64 = arith.divf %62, %63 : vector<8x128xf32>
    %65 = arith.addf %52, %55 : vector<8x128xf32>
    %66 = arith.negf %65 : vector<8x128xf32>
    %67 = math.exp %66 : vector<8x128xf32>
    %cst_20 = arith.constant 1.000000e+00 : f32
    %68 = vector.broadcast %cst_20 : f32 to vector<8x128xf32>
    %69 = arith.addf %68, %67 : vector<8x128xf32>
    %70 = arith.divf %68, %69 : vector<8x128xf32>
    %71 = arith.mulf %64, %58 : vector<8x128xf32>
    %72 = arith.addf %53, %71 : vector<8x128xf32>
    %73 = math.tanh %72 : vector<8x128xf32>
    %cst_21 = arith.constant 1.000000e+00 : f32
    %74 = vector.broadcast %cst_21 : f32 to vector<8x128xf32>
    %75 = arith.subf %74, %70 : vector<8x128xf32>
    %76 = arith.mulf %75, %73 : vector<8x128xf32>
    %77 = arith.mulf %70, %40 : vector<8x128xf32>
    %78 = arith.addf %76, %77 : vector<8x128xf32>
    %79 = arith.addi %6, %c1_i32 : i32
    %80 = vector.broadcast %79 : i32 to vector<8x1xi32>
    %81 = arith.cmpi eq, %5, %80 : vector<8x1xi32>
    %82 = vector.shape_cast %81 : vector<8x1xi1> to vector<8x1xi1>
    %83 = vector.broadcast %82 : vector<8x1xi1> to vector<8x128xi1>
    %84 = arith.select %83, %78, %46 : vector<8x128xi1>, vector<8x128xf32>
    %c2_i32 = arith.constant 2 : i32
    %85 = arith.index_cast %c2_i32 : i32 to index
    %c0_22 = arith.constant 0 : index
    %c0_23 = arith.constant 0 : index
    %86 = vector.load %arg1[%85, %c0_22, %c0_23] : memref<4x8x384xf32, #tpu.memory_space<vmem>>, vector<1x8x384xf32>
    %87 = vector.shape_cast %86 : vector<1x8x384xf32> to vector<8x384xf32>
    %cst_24 = arith.constant dense<0.000000e+00> : vector<8x384xf32>
    %88 = tpu.matmul %78, %3, %cst_24 {dimension_numbers = #tpu.dot_dimension_numbers<[1], [0], [0], [1], [0, 0, 1, 1], [], []>} : vector<8x128xf32>, vector<128x384xf32>, vector<8x384xf32> -> vector<8x384xf32>
    %89 = vector.extract_strided_slice %87 {offsets = [0, 0], sizes = [8, 128], strides = [1, 1]} : vector<8x384xf32> to vector<8x128xf32>
    %90 = vector.extract_strided_slice %87 {offsets = [0, 128], sizes = [8, 128], strides = [1, 1]} : vector<8x384xf32> to vector<8x128xf32>
    %91 = vector.extract_strided_slice %87 {offsets = [0, 256], sizes = [8, 128], strides = [1, 1]} : vector<8x384xf32> to vector<8x128xf32>
    %92 = vector.extract_strided_slice %88 {offsets = [0, 0], sizes = [8, 128], strides = [1, 1]} : vector<8x384xf32> to vector<8x128xf32>
    %93 = vector.extract_strided_slice %88 {offsets = [0, 128], sizes = [8, 128], strides = [1, 1]} : vector<8x384xf32> to vector<8x128xf32>
    %94 = vector.extract_strided_slice %88 {offsets = [0, 256], sizes = [8, 128], strides = [1, 1]} : vector<8x384xf32> to vector<8x128xf32>
    %95 = vector.broadcast %4 : vector<1x128xf32> to vector<8x128xf32>
    %96 = arith.addf %94, %95 : vector<8x128xf32>
    %97 = arith.addf %89, %92 : vector<8x128xf32>
    %98 = arith.negf %97 : vector<8x128xf32>
    %99 = math.exp %98 : vector<8x128xf32>
    %cst_25 = arith.constant 1.000000e+00 : f32
    %100 = vector.broadcast %cst_25 : f32 to vector<8x128xf32>
    %101 = arith.addf %100, %99 : vector<8x128xf32>
    %102 = arith.divf %100, %101 : vector<8x128xf32>
    %103 = arith.addf %90, %93 : vector<8x128xf32>
    %104 = arith.negf %103 : vector<8x128xf32>
    %105 = math.exp %104 : vector<8x128xf32>
    %cst_26 = arith.constant 1.000000e+00 : f32
    %106 = vector.broadcast %cst_26 : f32 to vector<8x128xf32>
    %107 = arith.addf %106, %105 : vector<8x128xf32>
    %108 = arith.divf %106, %107 : vector<8x128xf32>
    %109 = arith.mulf %102, %96 : vector<8x128xf32>
    %110 = arith.addf %91, %109 : vector<8x128xf32>
    %111 = math.tanh %110 : vector<8x128xf32>
    %cst_27 = arith.constant 1.000000e+00 : f32
    %112 = vector.broadcast %cst_27 : f32 to vector<8x128xf32>
    %113 = arith.subf %112, %108 : vector<8x128xf32>
    %114 = arith.mulf %113, %111 : vector<8x128xf32>
    %115 = arith.mulf %108, %78 : vector<8x128xf32>
    %116 = arith.addf %114, %115 : vector<8x128xf32>
    %117 = arith.addi %6, %c2_i32 : i32
    %118 = vector.broadcast %117 : i32 to vector<8x1xi32>
    %119 = arith.cmpi eq, %5, %118 : vector<8x1xi32>
    %120 = vector.shape_cast %119 : vector<8x1xi1> to vector<8x1xi1>
    %121 = vector.broadcast %120 : vector<8x1xi1> to vector<8x128xi1>
    %122 = arith.select %121, %116, %84 : vector<8x128xi1>, vector<8x128xf32>
    %c3_i32 = arith.constant 3 : i32
    %123 = arith.index_cast %c3_i32 : i32 to index
    %c0_28 = arith.constant 0 : index
    %c0_29 = arith.constant 0 : index
    %124 = vector.load %arg1[%123, %c0_28, %c0_29] : memref<4x8x384xf32, #tpu.memory_space<vmem>>, vector<1x8x384xf32>
    %125 = vector.shape_cast %124 : vector<1x8x384xf32> to vector<8x384xf32>
    %cst_30 = arith.constant dense<0.000000e+00> : vector<8x384xf32>
    %126 = tpu.matmul %116, %3, %cst_30 {dimension_numbers = #tpu.dot_dimension_numbers<[1], [0], [0], [1], [0, 0, 1, 1], [], []>} : vector<8x128xf32>, vector<128x384xf32>, vector<8x384xf32> -> vector<8x384xf32>
    %127 = vector.extract_strided_slice %125 {offsets = [0, 0], sizes = [8, 128], strides = [1, 1]} : vector<8x384xf32> to vector<8x128xf32>
    %128 = vector.extract_strided_slice %125 {offsets = [0, 128], sizes = [8, 128], strides = [1, 1]} : vector<8x384xf32> to vector<8x128xf32>
    %129 = vector.extract_strided_slice %125 {offsets = [0, 256], sizes = [8, 128], strides = [1, 1]} : vector<8x384xf32> to vector<8x128xf32>
    %130 = vector.extract_strided_slice %126 {offsets = [0, 0], sizes = [8, 128], strides = [1, 1]} : vector<8x384xf32> to vector<8x128xf32>
    %131 = vector.extract_strided_slice %126 {offsets = [0, 128], sizes = [8, 128], strides = [1, 1]} : vector<8x384xf32> to vector<8x128xf32>
    %132 = vector.extract_strided_slice %126 {offsets = [0, 256], sizes = [8, 128], strides = [1, 1]} : vector<8x384xf32> to vector<8x128xf32>
    %133 = vector.broadcast %4 : vector<1x128xf32> to vector<8x128xf32>
    %134 = arith.addf %132, %133 : vector<8x128xf32>
    %135 = arith.addf %127, %130 : vector<8x128xf32>
    %136 = arith.negf %135 : vector<8x128xf32>
    %137 = math.exp %136 : vector<8x128xf32>
    %cst_31 = arith.constant 1.000000e+00 : f32
    %138 = vector.broadcast %cst_31 : f32 to vector<8x128xf32>
    %139 = arith.addf %138, %137 : vector<8x128xf32>
    %140 = arith.divf %138, %139 : vector<8x128xf32>
    %141 = arith.addf %128, %131 : vector<8x128xf32>
    %142 = arith.negf %141 : vector<8x128xf32>
    %143 = math.exp %142 : vector<8x128xf32>
    %cst_32 = arith.constant 1.000000e+00 : f32
    %144 = vector.broadcast %cst_32 : f32 to vector<8x128xf32>
    %145 = arith.addf %144, %143 : vector<8x128xf32>
    %146 = arith.divf %144, %145 : vector<8x128xf32>
    %147 = arith.mulf %140, %134 : vector<8x128xf32>
    %148 = arith.addf %129, %147 : vector<8x128xf32>
    %149 = math.tanh %148 : vector<8x128xf32>
    %cst_33 = arith.constant 1.000000e+00 : f32
    %150 = vector.broadcast %cst_33 : f32 to vector<8x128xf32>
    %151 = arith.subf %150, %146 : vector<8x128xf32>
    %152 = arith.mulf %151, %149 : vector<8x128xf32>
    %153 = arith.mulf %146, %116 : vector<8x128xf32>
    %154 = arith.addf %152, %153 : vector<8x128xf32>
    %155 = arith.addi %6, %c3_i32 : i32
    %156 = vector.broadcast %155 : i32 to vector<8x1xi32>
    %157 = arith.cmpi eq, %5, %156 : vector<8x1xi32>
    %158 = vector.shape_cast %157 : vector<8x1xi1> to vector<8x1xi1>
    %159 = vector.broadcast %158 : vector<8x1xi1> to vector<8x128xi1>
    %160 = arith.select %159, %154, %122 : vector<8x128xi1>, vector<8x128xf32>
    %c4_i32_34 = arith.constant 4 : i32
    %c0_35 = arith.constant 0 : index
    %c0_36 = arith.constant 0 : index
    %161 = vector.load %arg8[%c0_35, %c0_36] : memref<8x128xf32, #tpu.memory_space<vmem>>, vector<8x128xf32>
    tpu.vector_store %arg8[%c0_35, %c0_36], %154 {strides = array<i32>} : memref<8x128xf32, #tpu.memory_space<vmem>>, vector<8x128xf32>,
    %c0_37 = arith.constant 0 : index
    %c0_38 = arith.constant 0 : index
    %162 = vector.load %arg9[%c0_37, %c0_38] : memref<8x128xf32, #tpu.memory_space<vmem>>, vector<8x128xf32>
    tpu.vector_store %arg9[%c0_37, %c0_38], %160 {strides = array<i32>} : memref<8x128xf32, #tpu.memory_space<vmem>>, vector<8x128xf32>,
    %c1_i32_39 = arith.constant 1 : i32
    %163 = arith.cmpi eq, %arg0, %c1_i32_39 : i32
    %164 = arith.extui %163 : i1 to i32
    %c0_i32_40 = arith.constant 0 : i32
    %165 = arith.cmpi ne, %164, %c0_i32_40 : i32
    scf.if %165 {
      %c0_41 = arith.constant 0 : index
      %c0_42 = arith.constant 0 : index
      %166 = vector.load %arg5[%c0_41, %c0_42] : memref<128x128xf32, #tpu.memory_space<vmem>>, vector<128x128xf32>
      %cst_43 = arith.constant dense<0.000000e+00> : vector<8x128xf32>
      %167 = tpu.matmul %160, %166, %cst_43 {dimension_numbers = #tpu.dot_dimension_numbers<[1], [0], [0], [1], [0, 0, 1, 1], [], []>} : vector<8x128xf32>, vector<128x128xf32>, vector<8x128xf32> -> vector<8x128xf32>
      %c0_44 = arith.constant 0 : index
      %c0_45 = arith.constant 0 : index
      %168 = vector.load %arg6[%c0_44, %c0_45] : memref<1x128xf32, #tpu.memory_space<vmem>>, vector<1x128xf32>
      %169 = vector.broadcast %168 : vector<1x128xf32> to vector<8x128xf32>
      %170 = arith.addf %167, %169 : vector<8x128xf32>
      %c0_46 = arith.constant 0 : index
      %c0_47 = arith.constant 0 : index
      %171 = vector.load %arg7[%c0_46, %c0_47] : memref<8x128xf32, #tpu.memory_space<vmem>>, vector<8x128xf32>
      tpu.vector_store %arg7[%c0_46, %c0_47], %170 {strides = array<i32>} : memref<8x128xf32, #tpu.memory_space<vmem>>, vector<8x128xf32>,
    } else {
    }
    return
  }
  func.func @transform_0(%arg0: i32) -> (i32, i32, i32) {
    %c0_i32 = arith.constant 0 : i32
    %c0_i32_0 = arith.constant 0 : i32
    %c0_i32_1 = arith.constant 0 : i32
    return %arg0, %c0_i32, %c0_i32_0 : i32, i32, i32
  }
  func.func @transform_1(%arg0: i32) -> (i32, i32) {
    %c0_i32 = arith.constant 0 : i32
    %c0_i32_0 = arith.constant 0 : i32
    %c0_i32_1 = arith.constant 0 : i32
    return %c0_i32, %c0_i32_0 : i32, i32
  }
  func.func @transform_2(%arg0: i32) -> (i32, i32) {
    %c0_i32 = arith.constant 0 : i32
    %c0_i32_0 = arith.constant 0 : i32
    %c0_i32_1 = arith.constant 0 : i32
    return %c0_i32, %c0_i32_0 : i32, i32
  }
  func.func @transform_3(%arg0: i32) -> (i32, i32) {
    %c0_i32 = arith.constant 0 : i32
    %c0_i32_0 = arith.constant 0 : i32
    %c0_i32_1 = arith.constant 0 : i32
    return %c0_i32, %c0_i32_0 : i32, i32
  }
  func.func @transform_4(%arg0: i32) -> (i32, i32) {
    %c0_i32 = arith.constant 0 : i32
    %c0_i32_0 = arith.constant 0 : i32
    %c0_i32_1 = arith.constant 0 : i32
    return %c0_i32, %c0_i32_0 : i32, i32
  }
  func.func @transform_5(%arg0: i32) -> (i32, i32) {
    %c0_i32 = arith.constant 0 : i32
    %c0_i32_0 = arith.constant 0 : i32
    %c0_i32_1 = arith.constant 0 : i32
    return %c0_i32, %c0_i32_0 : i32, i32
  }
  func.func @transform_6(%arg0: i32) -> (i32, i32) {
    %c0_i32 = arith.constant 0 : i32
    %c0_i32_0 = arith.constant 0 : i32
    %c0_i32_1 = arith.constant 0 : i32
    return %c0_i32, %c0_i32_0 : i32, i32
  }
}

</mosaic_0001>

<bundles_post_ra>
// kernel: tpu_custom_call.1
= control target key start
LH: loop header
LB: loop body
LE: loop exit
PB: predicated region body
PF: predicated region fallthrough
CT: control target
= control target key end

     0   :  { %11 = vsyncpa [#allocation5], 0  ;;  %s1803_s0 = inlined_call_operand.hbm [shape: f32[8,8,384], index: 0, kind: input, shape index: {}]   ;;  %s1804_s1 = inlined_call_operand.vmem [shape: s32[8,1], index: 1, kind: input, shape index: {}]   ;;  %s1805_s2 = inlined_call_operand.hbm [shape: f32[128,384], index: 2, kind: input, shape index: {}]   ;;  %s1806_s3 = inlined_call_operand.vmem [shape: f32[1,128], index: 3, kind: input, shape index: {}]   ;;  %s1807_s4 = inlined_call_operand.hbm [shape: f32[128,128], index: 4, kind: input, shape index: {}]   ;;  %s1808_s5 = inlined_call_operand.vmem [shape: f32[1,128], index: 5, kind: input, shape index: {}]   ;;  %s1809_s6 = inlined_call_operand.hbm [shape: f32[8,128], index: 6, kind: output, shape index: {}]  }
   0x1   :  { %13 = vsyncpa [#allocation5 + $0x1], 0 }
   0x2   :  { %14 = vsyncpa [#allocation8], 0 }
   0x3   :  { %15 = vsyncpa [#allocation6], 0  ;;  %s1325_s21 = smov 0   ;;  %s1327_s22 = smov 0  }
   0x4   :  { %s1329_s23 = smov 0   ;;  %s1331_s24 = smov 0  }
   0x5 LB: > { %s1344_s25 = sadd.s32 4294967295, %s1279_s24   ;;  %p41_p0 = scmp.ne.s32.totalorder %s1271_s22, %s1267_s21  ;;  %s1279_s24 = sphi %s1331_s24, %s1817_s24   ;;  %s1275_s23 = sphi %s1329_s23, %s1816_s23   ;;  %s1271_s22 = sphi %s1327_s22, %s1815_s22   ;;  %s1267_s21 = sphi %s1325_s21, %s1814_s21  }
   0x6   : > { %p42_p1 = scmp.eq.s32.totalorder %s1344_s25, 0  ;;  %p965_p2 = scmp.ge.s32.totalorder %s1279_s24, 1 }
   0x7   : > { %p178_p3 = scmp.lt.s32.totalorder %s1279_s24, 3  ;;  %p966_p4 = scmp.ne.s32.totalorder %s1344_s25, 0 }
   0x8   : > { %p1353_p5 = por %p42_p1, %p41_p0  ;;  %s192_s29 = sshll.u32 %s1805_s2, 4  ;;  %s193_s29 = int_to_ptr.hbm [resolvable:$true] %s192_s29 }
   0x9   : > { %p1360_p6 = pnand %p965_p2, %p178_p3  ;;  %s1281_s7 = smov [#allocation7]  }
   0xa   : > { %s194_s8 = sshll.u32 %s1281_s7, 4  ;;  %s209_s11 = sshll.u32 %s1807_s4, 4  ;;  %s195_s8 = int_to_ptr.vmem [resolvable:$true] %s194_s8  ;;  %s210_s11 = int_to_ptr.hbm [resolvable:$true] %s209_s11 }
   0xb   : > { %p1016_p7 = pneg %p1360_p6  ;;  %s1282_s12 = smov 384  }
   0xc   : > { %s1283_s13 = smov 24   ;;  %s1284_s14 = smov [#allocation9]  }
   0xd   : > { %p1017_p8 = pnand %p1016_p7, %p42_p1  ;;  %s211_s15 = sshll.u32 %s1284_s14, 4  ;;  %s212_s15 = int_to_ptr.vmem [resolvable:$true] %s211_s15 }
   0xe   : > { %s1285_s16 = smov 128   ;;  %s1286_s17 = smov 8  }
   0xf   : > { %1019 = dma.hbm_to_vmem [thread:$0]  (!%p1017_p8), %s193_s29, 6144, %s195_s8, [#allocation8], %s1282_s12, %s1282_s12, %s1283_s13  }
  0x10   : > { %1022 = dma.hbm_to_vmem [thread:$0]  (!%p1017_p8), %s210_s11, 2048, %s212_s15, [#allocation8], %s1285_s16, %s1285_s16, %s1286_s17  }
  0x11   : > { %s1375_s18 = sadd.s32 1, %s1279_s24   ;;  %s28_s20 = sadd.s32 1, %s1275_s23 }
  0x12   : > { %s25_s19 = ssub.s32 %s1279_s24, %s1375_s18  ;;  %p35_p10 = scmp.ne.s32.totalorder %s1275_s23, %s1271_s22 }
  0x13   : > { %p26_p9 = scmp.eq.s32.totalorder %s25_s19, 0  ;;  %p36_p11 = scmp.eq.s32.totalorder %s1279_s24, 0 }
  0x14   : > { %p1029_p13 = scmp.lt.s32.totalorder %s1279_s24, 2  ;;  %s228_s27 = sand.u32 1, %s1275_s23  }
  0x15   : > { %s1384_s21 = scalar_select %p26_p9, %s1275_s23, %s28_s20  }
  0x16   : > { %p37_p12 = por %p36_p11, %p35_p10  ;;  %s1000_s28 = smul.u32 96, %s1279_s24 }
  0x17   : > { %s999_s29 = smul.u32 96, %s228_s27  ;;  %s229_s16 = scalar_lea.sflag [#allocation5], %s228_s27 }
  0x18   : > { %s238_s9 = scalar_lea.hbm %s1803_s0, %s1000_s28  ;;  %p1392_p0 = pnand %p1029_p13, %p37_p12 }
  0x19   : > { %s239_s11 = sshll.u32 %s238_s9, 4  ;;  %s232_s14 = scalar_lea.vmem [#allocation4], %s999_s29  ;;  %s240_s11 = int_to_ptr.hbm [resolvable:$true] %s239_s11 }
  0x1a   : > { %s241_s15 = sshll.u32 %s232_s14, 4  ;;  %s1179_s17 = sshra.s32 %s240_s11, 4  ;;  %s242_s15 = int_to_ptr.vmem [resolvable:$true] %s241_s15  ;;  %s1180_s17 = int_to_ptr.hbm [resolvable:$true] %s1179_s17 }
  0x1b   : > { %s1181_s19 = scalar_lea.hbm %s1180_s17, 96  ;;  %p1183_p3 = pneg %p1392_p0 }
  0x1c   : > { %p1182_p2 = scmp.ne.s32.totalorder %s1180_s17, %s1181_s19  ;;  %s1186_s28 = scalar_lea.hbm %s1803_s0, 192 }
  0x1d   : > { %p1187_p9 = scmp.lt.s32.totalorder %s1180_s17, %s1803_s0  ;;  %p1188_p10 = scmp.lt.s32.totalorder %s1186_s28, %s1181_s19 }
  0x1e   : > { %p1184_p7 = pnand %p1183_p3, %p1182_p2 }
  0x1f   : > { %p1189_p11 = por %p1188_p10, %p1187_p9 }
  0x20   : > { %p1185_p8 = pneg %p1184_p7 }
  0x22   : > { %p1190_p12 = pnand %p1189_p11, %p1185_p8 }
  0x24   : > { %1193 = shalt.err (!%p1190_p12)
}
  0x25   : > { %1026 = dma.hbm_to_vmem [thread:$0]  (!%p1392_p0), %s240_s11, 1536, %s242_s15, %s229_s16, %s1282_s12, %s1282_s12, %s1283_s13  }
  0x26   : > { %253 = sbr.rel (%p1360_p6) target bundleno = 950 (0x3b6), region = 44  ;;  %s255_s27 = sand.u32 (!%p1360_p6), 1, %s1271_s22  }
  0x27   : > { %s1001_s29 = smul.u32 (!%p1360_p6), 96, %s255_s27  ;;  %s256_s9 = scalar_lea.sflag (!%p1360_p6), [#allocation5], %s255_s27 }
  0x29   : > { %s1412_s14 = scalar_lea.vmem (!%p1360_p6), [#allocation4], %s1001_s29 }
  0x2b   : > { %1254 = dma.done.wait (%p1353_p5), %s256_s9, 1536  }
  0x2c   : > { %1256 = vsyncadd (%p1353_p5), %s256_s9, 4294965760 }
  0x2d   : > { %1258 = dma.done.wait (%p42_p1), [#allocation8], 8192  }
  0x2e   : > { %1260 = vsyncadd (%p42_p1), [#allocation8], 4294959104  ;;  %298 = sbr.rel (%p966_p4) target bundleno = 54 (0x36), region = 60 }
  0x33   : > { %v1287_v0 = vmov 0.0  }
  0x34   : > { %299 = vst [vmem:[#allocation2] sm:$0xff] %v1287_v0 }
  0x35   : > { %300 = vst [vmem:[#allocation3] sm:$0xff] %v1287_v0 }
  0x36 PF: > { %v1424_v1 = vld [vmem:[#allocation7 + $0x168] sm:$0xff]  ;;  %v1426_v2 = vld [vmem:[#allocation7 + $0x170] sm:$0xff]  ;;  %v1432_v4 = vld [vmem:[#allocation7 + $0x158] sm:$0xff]  ;;  %s1477_s26 = sshll.u32 %s1344_s25, 2  ;;  %v1288_v20 = vmov 0   ;;  %p994_p1 = scmp.ne.s32.totalorder %s1344_s25, 1 }
  0x37   : > { %v1428_v3 = vld [vmem:[#allocation7 + $0x150] sm:$0xff]  ;;  %357 = vmatpush.msra.mxu0 %v1424_v1  ;;  %377 = vmatpush.msra.mxu1 %v1426_v2  ;;  %v1434_v5 = vld [vmem:[#allocation7 + $0x138] sm:$0xff]  ;;  %v1436_v6 = vld [vmem:[#allocation7 + $0x140] sm:$0xff]  ;;  %v468_v24 = vstv %s1477_s26  ;;  %s588_s13 = sadd.s32 1, %s1477_s26  ;;  %s709_s15 = sadd.s32 2, %s1477_s26 }
  0x38   : > { %480 = vmatpush.msra.mxu3 %v1424_v1  ;;  %v1441_v7 = vld [vmem:[#allocation7 + $0x120] sm:$0xff]  ;;  %v1443_v8 = vld [vmem:[#allocation7 + $0x128] sm:$0xff]  ;;  %v1450_v10 = vld [vmem:[#allocation7 + $0x110] sm:$0xff]  ;;  %1075 = vset.pattern.permute.xlu0 %v1288_v20  ;;  %s830_s16 = sadd.s32 3, %s1477_s26 }
  0x39   : > { %358 = vmatpush.msra.mxu0 %v1428_v3  ;;  %378 = vmatpush.msra.mxu1 %v1432_v4  ;;  %v1448_v9 = vld [vmem:[#allocation7 + $0x108] sm:$0xff]  ;;  %v1455_v11 = vld [vmem:[#allocation7 + $0xf0] sm:$0xff]  ;;  %v1457_v12 = vld [vmem:[#allocation7 + $0xf8] sm:$0xff] }
  0x3a   : > { %481 = vmatpush.msra.mxu3 %v1428_v3  ;;  %v1459_v13 = vld [vmem:[#allocation7 + $0x178] sm:$0xff]  ;;  %v1464_v14 = vld [vmem:[#allocation7 + $0x160] sm:$0xff]  ;;  %v1474_v17 = vld [vmem:[#allocation7 + $0x148] sm:$0xff]  ;;  %1076 = vset.pattern.permute.xlu1 %v1288_v20 }
  0x3b   : > { %359 = vmatpush.msra.mxu0 %v1434_v5  ;;  %379 = vmatpush.msra.mxu1 %v1436_v6  ;;  %v1466_v15 = vld [vmem:[#allocation7 + $0xd8] sm:$0xff]  ;;  %v1468_v16 = vld [vmem:[#allocation7 + $0xe0] sm:$0xff]  ;;  %v1481_v19 = vld [vmem:[#allocation7 + $0xc8] sm:$0xff] }
  0x3c   : > { %482 = vmatpush.msra.mxu3 %v1434_v5  ;;  %397 = vmatpush.msra.mxu2 %v1459_v13  ;;  %v1479_v18 = vld [vmem:[#allocation7 + $0xc0] sm:$0xff]  ;;  %v1487_v21 = vld [vmem:[#allocation7 + $0x130] sm:$0xff]  ;;  %v1489_v22 = vld [vmem:[#allocation7 + $0xa8] sm:$0xff] }
  0x3d   : > { %360 = vmatpush.msra.mxu0 %v1441_v7  ;;  %380 = vmatpush.msra.mxu1 %v1443_v8  ;;  %v1491_v23 = vld [vmem:[#allocation7 + $0xb0] sm:$0xff]  ;;  %v1498_v25 = vld [vmem:[#allocation7 + $0x118] sm:$0xff]  ;;  %v1513_v29 = vld [vmem:[#allocation7 + $0x100] sm:$0xff] }
  0x3e   : > { %483 = vmatpush.msra.mxu3 %v1441_v7  ;;  %398 = vmatpush.msra.mxu2 %v1464_v14  ;;  %v1500_v26 = vld [vmem:[#allocation7 + $0x90] sm:$0xff]  ;;  %v1502_v27 = vld [vmem:[#allocation7 + $0x98] sm:$0xff]  ;;  %v1518_v31 = vld [vmem:[#allocation7 + $0x80] sm:$0xff] }
  0x3f   : > { %361 = vmatpush.msra.mxu0 %v1448_v9  ;;  %381 = vmatpush.msra.mxu1 %v1450_v10  ;;  %v1508_v28 = vld [vmem:[%s1804_s1] sm:$0xff]  ;;  %v1516_v30 = vld [vmem:[#allocation7 + $0x78] sm:$0xff]  ;;  %v1525_v33 = vld [vmem:[#allocation7 + $0xe8] sm:$0xff] }
  0x40   : > { %484 = vmatpush.msra.mxu3 %v1448_v9  ;;  %399 = vmatpush.msra.mxu2 %v1474_v17  ;;  %vm469_vm0 = vcmp.eq.s32.totalorder %v1508_v28, %v468_v24  ;;  %v1527_v34 = vld [vmem:[#allocation7 + $0x60] sm:$0xff]  ;;  %v1529_v35 = vld [vmem:[#allocation7 + $0x68] sm:$0xff]  ;;  %v1534_v36 = vld [vmem:[#allocation7 + $0xd0] sm:$0xff] }
  0x41   : > { %362 = vmatpush.msra.mxu0 %v1455_v11  ;;  %382 = vmatpush.msra.mxu1 %v1457_v12  ;;  %v470_v32 = vsel %vm469_vm0, 1, %v1288_v20  ;;  %v1536_v37 = vld [vmem:[#allocation7 + $0x48] sm:$0xff]  ;;  %v1538_v38 = vld [vmem:[#allocation7 + $0x50] sm:$0xff]  ;;  %v1544_v39 = vld [vmem:[#allocation7 + $0xb8] sm:$0xff] }
  0x42   : > { %485 = vmatpush.msra.mxu3 %v1455_v11  ;;  %400 = vmatpush.msra.mxu2 %v1487_v21  ;;  %v1546_v40 = vld [vmem:[#allocation7 + $0x30] sm:$0xff]  ;;  %v1548_v41 = vld [vmem:[#allocation7 + $0x38] sm:$0xff]  ;;  %v1554_v42 = vld [vmem:[#allocation7 + $0xa0] sm:$0xff] }
  0x43   : > { %363 = vmatpush.msra.mxu0 %v1466_v15  ;;  %383 = vmatpush.msra.mxu1 %v1468_v16  ;;  %v1556_v43 = vld [vmem:[#allocation7 + $0x18] sm:$0xff]  ;;  %v1558_v44 = vld [vmem:[#allocation7 + $0x20] sm:$0xff]  ;;  %v1564_v45 = vld [vmem:[#allocation7 + $0x88] sm:$0xff] }
  0x44   : > { %486 = vmatpush.msra.mxu3 %v1466_v15  ;;  %401 = vmatpush.msra.mxu2 %v1498_v25  ;;  %v1566_v46 = vld [vmem:[#allocation7] sm:$0xff]  ;;  %v1568_v47 = vld [vmem:[#allocation7 + $0x8] sm:$0xff]  ;;  %v1574_v48 = vld [vmem:[#allocation2] sm:$0xff] }
  0x45   : > { %364 = vmatpush.msra.mxu0 %v1479_v18  ;;  %384 = vmatpush.msra.mxu1 %v1481_v19  ;;  %v1577_v49 = vld [vmem:[#allocation7 + $0x70] sm:$0xff]  ;;  %v1584_v50 = vld [vmem:[#allocation7 + $0x58] sm:$0xff]  ;;  %v1588_v51 = vld [vmem:[#allocation7 + $0x40] sm:$0xff] }
  0x46   : > { %487 = vmatpush.msra.mxu3 %v1479_v18  ;;  %402 = vmatpush.msra.mxu2 %v1513_v29  ;;  %v1594_v52 = vld [vmem:[#allocation7 + $0x28] sm:$0xff]  ;;  %v1600_v53 = vld [vmem:[#allocation7 + $0x10] sm:$0xff]  ;;  %v354_v54 = vld [vmem:[%s1412_s14] sm:$0xff] }
  0x47   : > { %365 = vmatpush.msra.mxu0 %v1489_v22  ;;  %385 = vmatpush.msra.mxu1 %v1491_v23  ;;  %v355_v55 = vld [vmem:[%s1412_s14 + $0x8] sm:$0xff] }
  0x48   : > { %472 = vperm.xlu0 %1075, %v470_v32   ;;  %403 = vmatpush.msra.mxu2 %v1525_v33 }
  0x49   : > { %366 = vmatpush.msra.mxu0 %v1500_v26  ;;  %386 = vmatpush.msra.mxu1 %v1502_v27 }
  0x4a   : > { %488 = vmatpush.msra.mxu3 %v1489_v22  ;;  %404 = vmatpush.msra.mxu2 %v1534_v36 }
  0x4b   : > { %367 = vmatpush.msra.mxu0 %v1516_v30  ;;  %387 = vmatpush.msra.mxu1 %v1518_v31 }
  0x4c   : > { %489 = vmatpush.msra.mxu3 %v1500_v26  ;;  %405 = vmatpush.msra.mxu2 %v1544_v39 }
  0x4d   : > { %368 = vmatpush.msra.mxu0 %v1527_v34  ;;  %388 = vmatpush.msra.mxu1 %v1529_v35 }
  0x4e   : > { %490 = vmatpush.msra.mxu3 %v1516_v30  ;;  %406 = vmatpush.msra.mxu2 %v1554_v42 }
  0x4f   : > { %369 = vmatpush.msra.mxu0 %v1536_v37  ;;  %389 = vmatpush.msra.mxu1 %v1538_v38 }
  0x50   : > { %491 = vmatpush.msra.mxu3 %v1527_v34  ;;  %407 = vmatpush.msra.mxu2 %v1564_v45 }
  0x51   : > { %370 = vmatpush.msra.mxu0 %v1546_v40  ;;  %390 = vmatpush.msra.mxu1 %v1548_v41 }
  0x52   : > { %492 = vmatpush.msra.mxu3 %v1536_v37  ;;  %408 = vmatpush.msra.mxu2 %v1577_v49 }
  0x53   : > { %371 = vmatpush.msra.mxu0 %v1556_v43  ;;  %391 = vmatpush.msra.mxu1 %v1558_v44 }
  0x54   : > { %493 = vmatpush.msra.mxu3 %v1546_v40  ;;  %409 = vmatpush.msra.mxu2 %v1584_v50 }
  0x55   : > { %372 = vmatpush.msra.mxu0 %v1566_v46  ;;  %392 = vmatpush.msra.mxu1 %v1568_v47 }
  0x56   : > { %373 = vmatmul.f32.vlgmr.msra.gmra.mxu0 %v1574_v48  ;;  %393 = vmatmul.f32.vlgmr.msra.gmra.mxu1 %v1574_v48 }
  0x57   : > { %500 = vmatpush.msrb.mxu0 %v1426_v2  ;;  %520 = vmatpush.msrb.mxu1 %v1459_v13 }
  0x58   : > { %494 = vmatpush.msra.mxu3 %v1556_v43  ;;  %410 = vmatpush.msra.mxu2 %v1588_v51 }
  0x59   : > { %501 = vmatpush.msrb.mxu0 %v1432_v4  ;;  %521 = vmatpush.msrb.mxu1 %v1464_v14 }
  0x5a   : > { %495 = vmatpush.msra.mxu3 %v1566_v46  ;;  %411 = vmatpush.msra.mxu2 %v1594_v52 }
  0x5b   : > { %502 = vmatpush.msrb.mxu0 %v1436_v6  ;;  %522 = vmatpush.msrb.mxu1 %v1474_v17 }
  0x5c   : > { %621 = vmatpush.msrb.mxu3 %v1426_v2  ;;  %412 = vmatpush.msra.mxu2 %v1600_v53 }
  0x5d   : > { %503 = vmatpush.msrb.mxu0 %v1443_v8  ;;  %523 = vmatpush.msrb.mxu1 %v1487_v21 }
  0x5e   : > { %413 = vmatmul.f32.vlgmr.msra.gmra.mxu2 %v1574_v48  ;;  %622 = vmatpush.msrb.mxu3 %v1432_v4 }
  0x5f   : > { %504 = vmatpush.msrb.mxu0 %v1450_v10  ;;  %524 = vmatpush.msrb.mxu1 %v1498_v25 }
  0x60   : > { %601 = vmatpush.msrb.mxu2 %v1424_v1  ;;  %623 = vmatpush.msrb.mxu3 %v1436_v6 }
  0x61   : > { %505 = vmatpush.msrb.mxu0 %v1457_v12  ;;  %525 = vmatpush.msrb.mxu1 %v1513_v29 }
  0x62   : > { %602 = vmatpush.msrb.mxu2 %v1428_v3  ;;  %624 = vmatpush.msrb.mxu3 %v1443_v8 }
  0x63   : > { %506 = vmatpush.msrb.mxu0 %v1468_v16  ;;  %526 = vmatpush.msrb.mxu1 %v1525_v33 }
  0x64   : > { %603 = vmatpush.msrb.mxu2 %v1434_v5  ;;  %625 = vmatpush.msrb.mxu3 %v1450_v10 }
  0x65   : > { %507 = vmatpush.msrb.mxu0 %v1481_v19  ;;  %527 = vmatpush.msrb.mxu1 %v1534_v36 }
  0x66   : > { %604 = vmatpush.msrb.mxu2 %v1441_v7  ;;  %626 = vmatpush.msrb.mxu3 %v1457_v12 }
  0x67   : > { %508 = vmatpush.msrb.mxu0 %v1491_v23  ;;  %528 = vmatpush.msrb.mxu1 %v1544_v39 }
  0x68   : > { %605 = vmatpush.msrb.mxu2 %v1448_v9  ;;  %627 = vmatpush.msrb.mxu3 %v1468_v16 }
  0x69   : > { %509 = vmatpush.msrb.mxu0 %v1502_v27  ;;  %529 = vmatpush.msrb.mxu1 %v1554_v42 }
  0x6a   : > { %606 = vmatpush.msrb.mxu2 %v1455_v11  ;;  %628 = vmatpush.msrb.mxu3 %v1481_v19 }
  0x6b   : > { %510 = vmatpush.msrb.mxu0 %v1518_v31  ;;  %530 = vmatpush.msrb.mxu1 %v1564_v45 }
  0x6c   : > { %607 = vmatpush.msrb.mxu2 %v1466_v15  ;;  %629 = vmatpush.msrb.mxu3 %v1491_v23 }
  0x6d   : > { %511 = vmatpush.msrb.mxu0 %v1529_v35  ;;  %531 = vmatpush.msrb.mxu1 %v1577_v49 }
  0x6e   : > { %608 = vmatpush.msrb.mxu2 %v1479_v18  ;;  %630 = vmatpush.msrb.mxu3 %v1502_v27 }
  0x6f   : > { %512 = vmatpush.msrb.mxu0 %v1538_v38  ;;  %532 = vmatpush.msrb.mxu1 %v1584_v50 }
  0x70   : > { %609 = vmatpush.msrb.mxu2 %v1489_v22  ;;  %631 = vmatpush.msrb.mxu3 %v1518_v31 }
  0x71   : > { %513 = vmatpush.msrb.mxu0 %v1548_v41  ;;  %533 = vmatpush.msrb.mxu1 %v1588_v51 }
  0x72   : > { %610 = vmatpush.msrb.mxu2 %v1500_v26  ;;  %632 = vmatpush.msrb.mxu3 %v1529_v35 }
  0x73   : > { %514 = vmatpush.msrb.mxu0 %v1558_v44  ;;  %534 = vmatpush.msrb.mxu1 %v1594_v52 }
  0x74   : > { %611 = vmatpush.msrb.mxu2 %v1516_v30  ;;  %633 = vmatpush.msrb.mxu3 %v1538_v38 }
  0x75   : > { %515 = vmatpush.msrb.mxu0 %v1568_v47  ;;  %535 = vmatpush.msrb.mxu1 %v1600_v53 }
  0x76   : > { %612 = vmatpush.msrb.mxu2 %v1527_v34  ;;  %634 = vmatpush.msrb.mxu3 %v1548_v41 }
  0x77   : > { %641 = vmatpush.msra.mxu0 %v1459_v13  ;;  %722 = vmatpush.msra.mxu1 %v1424_v1 }
  0x78   : > { %613 = vmatpush.msrb.mxu2 %v1536_v37  ;;  %635 = vmatpush.msrb.mxu3 %v1558_v44 }
  0x79   : > { %642 = vmatpush.msra.mxu0 %v1464_v14  ;;  %723 = vmatpush.msra.mxu1 %v1428_v3 }
  0x7a   : > { %614 = vmatpush.msrb.mxu2 %v1546_v40  ;;  %636 = vmatpush.msrb.mxu3 %v1568_v47 }
  0x7b   : > { %643 = vmatpush.msra.mxu0 %v1474_v17  ;;  %724 = vmatpush.msra.mxu1 %v1434_v5 }
  0x7c   : > { %615 = vmatpush.msrb.mxu2 %v1556_v43 }
  0x7d   : > { %644 = vmatpush.msra.mxu0 %v1487_v21  ;;  %725 = vmatpush.msra.mxu1 %v1441_v7 }
  0x7e   : > { %616 = vmatpush.msrb.mxu2 %v1566_v46 }
  0x7f   : > { %645 = vmatpush.msra.mxu0 %v1498_v25  ;;  %726 = vmatpush.msra.mxu1 %v1448_v9 }
  0x80   : > { %742 = vmatpush.msra.mxu2 %v1426_v2  ;;  %v589_v2 = vstv %s588_s13 }
  0x81   : > { %646 = vmatpush.msra.mxu0 %v1513_v29  ;;  %727 = vmatpush.msra.mxu1 %v1455_v11  ;;  %vm590_vm1 = vcmp.eq.s32.totalorder %v1508_v28, %v589_v2 }
  0x82   : > { %743 = vmatpush.msra.mxu2 %v1432_v4  ;;  %v591_v3 = vsel %vm590_vm1, 1, %v1288_v20 }
  0x83   : > { %647 = vmatpush.msra.mxu0 %v1525_v33  ;;  %728 = vmatpush.msra.mxu1 %v1466_v15 }
  0x84   : > { %744 = vmatpush.msra.mxu2 %v1436_v6  ;;  %593 = vperm.xlu0 %1075, %v591_v3   ;;  %v981_v3 = vld [vmem:[%s1412_s14 + $0x28] sm:$0xff] }
  0x85   : > { %648 = vmatpush.msra.mxu0 %v1534_v36  ;;  %729 = vmatpush.msra.mxu1 %v1479_v18 }
  0x86   : > { %745 = vmatpush.msra.mxu2 %v1443_v8  ;;  %v1722_v8 = vld [vmem:[%s1806_s3] ss:$0 sm:$0xff] }
  0x87   : > { %649 = vmatpush.msra.mxu0 %v1544_v39  ;;  %730 = vmatpush.msra.mxu1 %v1489_v22 }
  0x88   : > { %746 = vmatpush.msra.mxu2 %v1450_v10 }
  0x89   : > { %650 = vmatpush.msra.mxu0 %v1554_v42  ;;  %731 = vmatpush.msra.mxu1 %v1500_v26 }
  0x8a   : > { %747 = vmatpush.msra.mxu2 %v1457_v12 }
  0x8b   : > { %651 = vmatpush.msra.mxu0 %v1564_v45  ;;  %732 = vmatpush.msra.mxu1 %v1516_v30 }
  0x8c   : > { %748 = vmatpush.msra.mxu2 %v1468_v16 }
  0x8d   : > { %652 = vmatpush.msra.mxu0 %v1577_v49  ;;  %733 = vmatpush.msra.mxu1 %v1527_v34 }
  0x8e   : > { %749 = vmatpush.msra.mxu2 %v1481_v19 }
  0x8f   : > { %653 = vmatpush.msra.mxu0 %v1584_v50  ;;  %734 = vmatpush.msra.mxu1 %v1536_v37 }
  0x90   : > { %750 = vmatpush.msra.mxu2 %v1491_v23 }
  0x91   : > { %654 = vmatpush.msra.mxu0 %v1588_v51  ;;  %735 = vmatpush.msra.mxu1 %v1546_v40 }
  0x92   : > { %751 = vmatpush.msra.mxu2 %v1502_v27  ;;  %v356_v27 = vld [vmem:[%s1412_s14 + $0x10] sm:$0xff] }
  0x93   : > { %655 = vmatpush.msra.mxu0 %v1594_v52  ;;  %736 = vmatpush.msra.mxu1 %v1556_v43 }
  0x94   : > { %752 = vmatpush.msra.mxu2 %v1518_v31 }
  0x95   : > { %656 = vmatpush.msra.mxu0 %v1600_v53  ;;  %737 = vmatpush.msra.mxu1 %v1566_v46 }
  0x96   : > { %753 = vmatpush.msra.mxu2 %v1529_v35 }
  0x98   : > { %754 = vmatpush.msra.mxu2 %v1538_v38 }
  0x9a   : > { %755 = vmatpush.msra.mxu2 %v1548_v41 }
  0x9c   : > { %756 = vmatpush.msra.mxu2 %v1558_v44 }
  0x9e   : > { %757 = vmatpush.msra.mxu2 %v1568_v47 }
  0xd3   : > { %v374_v56 = vpop.f32.mrf.mxu0  ;;  %v394_v57 = vpop.f32.mrf.mxu1 }
  0xd4   : > { %v421_v58 = vadd.f32 %v374_v56, %v354_v54  ;;  %v441_v59 = vadd.f32 %v394_v57, %v355_v55 }
  0xd6   : > { %v977_v60 = vmul.f32 -1.442695, %v421_v58  ;;  %v978_v61 = vmul.f32 -1.442695, %v441_v59 }
  0xd8   : > { %1078 = vpow2.f32 %v977_v60 }
  0xd9   : > { %1080 = vpow2.f32 %v978_v61 }
  0xde   : > { %v1079_v62 = vpop.eup %1078 }
  0xdf   : > { %v1081_v63 = vpop.eup %1080  ;;  %v425_v0 = vadd.f32 1.0, %v1079_v62 }
  0xe0   : > { %v445_v1 = vadd.f32 1.0, %v1081_v63 }
  0xe1   : > { %1082 = vrcp.f32 %v425_v0  ;;  %v414_v11 = vpop.f32.mrf.mxu2  ;;  %v437_v12 = vand.u32 2147483648, %v425_v0  ;;  %v435_v16 = vand.u32 2147483647, %v425_v0  ;;  %vm431_vm3 = vweird.f32 %v425_v0 }
  0xe2   : > { %1084 = vrcp.f32 %v445_v1  ;;  %v420_v19 = vadd.f32 %v1722_v8, %v414_v11  ;;  %vm451_vm6 = vweird.f32 %v445_v1  ;;  %v457_v31 = vand.u32 2147483648, %v445_v1 }
  0xe3   : > { %v438_v23 = vor.u32 1.1754944e-38, %v437_v12  ;;  %vm436_vm5 = vcmp.eq.f32.partialorder %v435_v16, 8.507059e+37  ;;  %v455_v34 = vand.u32 2147483647, %v445_v1 }
  0xe4   : > { %v458_v38 = vor.u32 1.1754944e-38, %v457_v31 }
  0xe5   : > { %vm456_vm9 = vcmp.eq.f32.partialorder %v455_v34, 8.507059e+37 }
  0xe7   : > { %v1083_v4 = vpop.eup %1082 }
  0xe8   : > { %v1085_v5 = vpop.eup %1084  ;;  %v427_v6 = vmul.f32 %v1083_v4, %v425_v0  ;;  %vm432_vm2 = vweird.f32 %v1083_v4 }
  0xe9   : > { %v447_v7 = vmul.f32 %v1085_v5, %v445_v1  ;;  %vm433_vm4 = vmor %vm431_vm3, %vm432_vm2  ;;  %vm452_vm7 = vweird.f32 %v1085_v5 }
  0xea   : > { %v428_v9 = vsub.f32 1.0, %v427_v6  ;;  %vm453_vm8 = vmor %vm451_vm6, %vm452_vm7 }
  0xeb   : > { %v448_v10 = vsub.f32 1.0, %v447_v7 }
  0xec   : > { %v429_v15 = vmul.f32 %v1083_v4, %v428_v9 }
  0xed   : > { %v449_v18 = vmul.f32 %v1085_v5, %v448_v10 }
  0xee   : > { %v430_v22 = vadd.f32 %v1083_v4, %v429_v15 }
  0xef   : > { %v450_v26 = vadd.f32 %v1085_v5, %v449_v18 }
  0xf0   : > { %v434_v24 = vsel %vm433_vm4, %v1083_v4, %v430_v22 }
  0xf1   : > { %v439_v30 = vsel %vm436_vm5, %v438_v23, %v434_v24  ;;  %v454_v37 = vsel %vm453_vm8, %v1085_v5, %v450_v26  ;;  %v984_v23 = vld [vmem:[%s1412_s14 + $0x30] sm:$0xff]  ;;  %v985_v24 = vld [vmem:[%s1412_s14 + $0x38] sm:$0xff] }
  0xf2   : > { %v461_v32 = vmul.f32 %v439_v30, %v420_v19  ;;  %v459_v40 = vsel %vm456_vm9, %v458_v38, %v454_v37 }
  0xf3   : > { %v464_v41 = vsub.f32 1.0, %v459_v40  ;;  %v466_v46 = vmul.f32 %v459_v40, %v1574_v48 }
  0xf4   : > { %v462_v35 = vadd.f32 %v461_v32, %v356_v27 }
  0xf6   : > { %1086 = vtanh.f32 %v462_v35 }
  0xfc   : > { %v1087_v43 = vpop.eup %1086 }
  0xfd   : > { %v465_v44 = vmul.f32 %v1087_v43, %v464_v41  ;;  %v831_v41 = vstv %s830_s16 }
  0xfe   : > { %vm832_vm3 = vcmp.eq.s32.totalorder %v1508_v28, %v831_v41 }
  0xff   : > { %v1727_v47 = vadd.f32 %v466_v46, %v465_v44  ;;  %v833_v43 = vsel %vm832_vm3, 1, %v1288_v20 }
 0x101   : > { %496 = vmatmul.f32.vlgmr.msra.gmra.mxu3 %v1727_v47  ;;  %516 = vmatmul.f32.vlgmr.msrb.gmra.mxu0 %v1727_v47 }
 0x102   : > { %536 = vmatmul.f32.vlgmr.msrb.gmra.mxu1 %v1727_v47  ;;  %762 = vmatpush.msra.mxu3 %v1459_v13  ;;  %v980_v13 = vld [vmem:[%s1412_s14 + $0x20] sm:$0xff] }
 0x104   : > { %763 = vmatpush.msra.mxu3 %v1464_v14 }
 0x106   : > { %764 = vmatpush.msra.mxu3 %v1474_v17 }
 0x108   : > { %765 = vmatpush.msra.mxu3 %v1487_v21 }
 0x10a   : > { %766 = vmatpush.msra.mxu3 %v1498_v25  ;;  %v979_v25 = vld [vmem:[%s1412_s14 + $0x18] sm:$0xff] }
 0x10c   : > { %767 = vmatpush.msra.mxu3 %v1513_v29 }
 0x10e   : > { %768 = vmatpush.msra.mxu3 %v1525_v33 }
 0x110   : > { %769 = vmatpush.msra.mxu3 %v1534_v36 }
 0x112   : > { %770 = vmatpush.msra.mxu3 %v1544_v39 }
 0x114   : > { %771 = vmatpush.msra.mxu3 %v1554_v42 }
 0x116   : > { %772 = vmatpush.msra.mxu3 %v1564_v45 }
 0x118   : > { %773 = vmatpush.msra.mxu3 %v1577_v49 }
 0x11a   : > { %774 = vmatpush.msra.mxu3 %v1584_v50  ;;  %v710_v50 = vstv %s709_s15 }
 0x11b   : > { %vm711_vm10 = vcmp.eq.s32.totalorder %v1508_v28, %v710_v50 }
 0x11c   : > { %775 = vmatpush.msra.mxu3 %v1588_v51  ;;  %v712_v51 = vsel %vm711_vm10, 1, %v1288_v20 }
 0x11d   : > { %714 = vperm.xlu1 %1076, %v712_v51  }
 0x11e   : > { %776 = vmatpush.msra.mxu3 %v1594_v52 }
 0x120   : > { %777 = vmatpush.msra.mxu3 %v1600_v53 }
 0x125   : > { %835 = vperm.xlu1 %1076, %v833_v43  }
 0x17e   : > { %v517_v14 = vpop.f32.mrf.mxu0 }
 0x17f   : > { %v561_v17 = vadd.f32 %v980_v13, %v517_v14  ;;  %v537_v61 = vpop.f32.mrf.mxu1 }
 0x180   : > { %v540_v0 = vadd.f32 %v1722_v8, %v537_v61 }
 0x181   : > { %v983_v21 = vmul.f32 -1.442695, %v561_v17 }
 0x183   : > { %1088 = vpow2.f32 %v983_v21 }
 0x184   : > { %v497_v29 = vpop.f32.mrf.mxu3 }
 0x185   : > { %v541_v33 = vadd.f32 %v979_v25, %v497_v29 }
 0x187   : > { %v982_v36 = vmul.f32 -1.442695, %v541_v33 }
 0x189   : > { %v1089_v39 = vpop.eup %1088  ;;  %1090 = vpow2.f32 %v982_v36 }
 0x18a   : > { %v565_v42 = vadd.f32 1.0, %v1089_v39 }
 0x18c   : > { %1092 = vrcp.f32 %v565_v42  ;;  %v577_v5 = vand.u32 2147483648, %v565_v42  ;;  %vm571_vm0 = vweird.f32 %v565_v42  ;;  %v575_v7 = vand.u32 2147483647, %v565_v42 }
 0x18e   : > { %v578_v11 = vor.u32 1.1754944e-38, %v577_v5  ;;  %vm576_vm2 = vcmp.eq.f32.partialorder %v575_v7, 8.507059e+37 }
 0x18f   : > { %v1091_v45 = vpop.eup %1090 }
 0x190   : > { %v545_v48 = vadd.f32 1.0, %v1091_v45 }
 0x192   : > { %1094 = vrcp.f32 %v545_v48  ;;  %v1093_v49 = vpop.eup %1092  ;;  %v557_v57 = vand.u32 2147483648, %v545_v48  ;;  %v555_v59 = vand.u32 2147483647, %v545_v48  ;;  %vm551_vm12 = vweird.f32 %v545_v48 }
 0x193   : > { %v567_v52 = vmul.f32 %v1093_v49, %v565_v42  ;;  %vm572_vm15 = vweird.f32 %v1093_v49 }
 0x194   : > { %v558_v63 = vor.u32 1.1754944e-38, %v557_v57  ;;  %vm556_vm14 = vcmp.eq.f32.partialorder %v555_v59, 8.507059e+37  ;;  %vm573_vm1 = vmor %vm571_vm0, %vm572_vm15 }
 0x195   : > { %v568_v55 = vsub.f32 1.0, %v567_v52 }
 0x197   : > { %v569_v60 = vmul.f32 %v1093_v49, %v568_v55 }
 0x198   : > { %v1095_v53 = vpop.eup %1094 }
 0x199   : > { %v547_v54 = vmul.f32 %v1095_v53, %v545_v48  ;;  %vm552_vm11 = vweird.f32 %v1095_v53  ;;  %v570_v2 = vadd.f32 %v1093_v49, %v569_v60  ;;  %v986_v48 = vld [vmem:[%s1412_s14 + $0x40] sm:$0xff] }
 0x19a   : > { %vm553_vm13 = vmor %vm551_vm12, %vm552_vm11 }
 0x19b   : > { %v548_v56 = vsub.f32 1.0, %v547_v54  ;;  %v574_v10 = vsel %vm573_vm1, %v1093_v49, %v570_v2 }
 0x19c   : > { %v579_v12 = vsel %vm576_vm2, %v578_v11, %v574_v10 }
 0x19d   : > { %v549_v58 = vmul.f32 %v1095_v53, %v548_v56  ;;  %v584_v15 = vsub.f32 1.0, %v579_v12  ;;  %v586_v19 = vmul.f32 %v579_v12, %v1727_v47 }
 0x19f   : > { %v550_v62 = vadd.f32 %v1095_v53, %v549_v58 }
 0x1a1   : > { %v554_v1 = vsel %vm553_vm13, %v1095_v53, %v550_v62 }
 0x1a2   : > { %v559_v4 = vsel %vm556_vm14, %v558_v63, %v554_v1  ;;  %v989_v63 = vld [vmem:[%s1412_s14 + $0x48] sm:$0xff] }
 0x1a3   : > { %v581_v6 = vmul.f32 %v559_v4, %v540_v0 }
 0x1a5   : > { %v582_v9 = vadd.f32 %v981_v3, %v581_v6  ;;  %v990_v3 = vld [vmem:[%s1412_s14 + $0x50] sm:$0xff] }
 0x1a7   : > { %1096 = vtanh.f32 %v582_v9 }
 0x1ad   : > { %v1097_v16 = vpop.eup %1096 }
 0x1ae   : > { %v585_v18 = vmul.f32 %v1097_v16, %v584_v15 }
 0x1b0   : > { %v1756_v22 = vadd.f32 %v586_v19, %v585_v18 }
 0x1b2   : > { %617 = vmatmul.f32.vlgmr.msrb.gmra.mxu2 %v1756_v22  ;;  %637 = vmatmul.f32.vlgmr.msrb.gmra.mxu3 %v1756_v22 }
 0x1b3   : > { %657 = vmatmul.f32.vlgmr.msra.gmra.mxu0 %v1756_v22 }
 0x230   : > { %v658_v36 = vpop.f32.mrf.mxu0 }
 0x231   : > { %v661_v20 = vadd.f32 %v1722_v8, %v658_v36 }
 0x235   : > { %v618_v26 = vpop.f32.mrf.mxu2  ;;  %v638_v27 = vpop.f32.mrf.mxu3 }
 0x236   : > { %v662_v30 = vadd.f32 %v984_v23, %v618_v26  ;;  %v682_v31 = vadd.f32 %v985_v24, %v638_v27 }
 0x238   : > { %v987_v32 = vmul.f32 -1.442695, %v662_v30  ;;  %v988_v34 = vmul.f32 -1.442695, %v682_v31 }
 0x23a   : > { %1098 = vpow2.f32 %v987_v32 }
 0x23b   : > { %1100 = vpow2.f32 %v988_v34 }
 0x240   : > { %v1099_v35 = vpop.eup %1098 }
 0x241   : > { %v1101_v37 = vpop.eup %1100  ;;  %v666_v38 = vadd.f32 1.0, %v1099_v35 }
 0x242   : > { %v686_v40 = vadd.f32 1.0, %v1101_v37  ;;  %v473_v37 = vpop.permute.xlu0 %472 }
 0x243   : > { %1102 = vrcp.f32 %v666_v38  ;;  %v678_v21 = vand.u32 2147483648, %v666_v38  ;;  %v676_v33 = vand.u32 2147483647, %v666_v38  ;;  %vm672_vm5 = vweird.f32 %v666_v38 }
 0x244   : > { %1104 = vrcp.f32 %v686_v40  ;;  %v698_v52 = vand.u32 2147483648, %v686_v40  ;;  %vm692_vm9 = vweird.f32 %v686_v40  ;;  %v696_v53 = vand.u32 2147483647, %v686_v40 }
 0x245   : > { %v679_v28 = vor.u32 1.1754944e-38, %v678_v21  ;;  %vm677_vm7 = vcmp.eq.f32.partialorder %v676_v33, 8.507059e+37  ;;  %v353_v33 = vld [vmem:[#allocation3] sm:$0xff] }
 0x246   : > { %v699_v56 = vor.u32 1.1754944e-38, %v698_v52  ;;  %vm697_vm11 = vcmp.eq.f32.partialorder %v696_v53, 8.507059e+37 }
 0x249   : > { %v1103_v44 = vpop.eup %1102 }
 0x24a   : > { %v1105_v46 = vpop.eup %1104  ;;  %v668_v13 = vmul.f32 %v1103_v44, %v666_v38  ;;  %vm673_vm4 = vweird.f32 %v1103_v44  ;;  %v991_v38 = vld [vmem:[%s1412_s14 + $0x58] sm:$0xff] }
 0x24b   : > { %v688_v14 = vmul.f32 %v1105_v46, %v686_v40  ;;  %vm674_vm6 = vmor %vm672_vm5, %vm673_vm4  ;;  %vm693_vm8 = vweird.f32 %v1105_v46  ;;  %vm474_vm4 = vcmp.eq.s32.totalorder %v473_v37, 1 }
 0x24c   : > { %v669_v17 = vsub.f32 1.0, %v668_v13  ;;  %vm694_vm10 = vmor %vm692_vm9, %vm693_vm8 }
 0x24d   : > { %v689_v25 = vsub.f32 1.0, %v688_v14 }
 0x24e   : > { %v670_v29 = vmul.f32 %v1103_v44, %v669_v17  ;;  %v715_v17 = vpop.permute.xlu1 %714 }
 0x24f   : > { %v690_v39 = vmul.f32 %v1105_v46, %v689_v25 }
 0x250   : > { %v671_v42 = vadd.f32 %v1103_v44, %v670_v29  ;;  %v594_v29 = vpop.permute.xlu0 %593 }
 0x251   : > { %v691_v50 = vadd.f32 %v1105_v46, %v690_v39  ;;  %vm595_vm5 = vcmp.eq.s32.totalorder %v594_v29, 1 }
 0x252   : > { %v675_v45 = vsel %vm674_vm6, %v1103_v44, %v671_v42  ;;  %vm716_vm6 = vcmp.eq.s32.totalorder %v715_v17, 1 }
 0x253   : > { %v680_v49 = vsel %vm677_vm7, %v679_v28, %v675_v45  ;;  %v695_v55 = vsel %vm694_vm10, %v1105_v46, %v691_v50  ;;  %v475_v45 = vsel %vm474_vm4, %v1727_v47, %v353_v33 }
 0x254   : > { %v702_v51 = vmul.f32 %v680_v49, %v661_v20  ;;  %v700_v57 = vsel %vm697_vm11, %v699_v56, %v695_v55 }
 0x255   : > { %v705_v58 = vsub.f32 1.0, %v700_v57  ;;  %v707_v61 = vmul.f32 %v700_v57, %v1756_v22 }
 0x256   : > { %v703_v54 = vadd.f32 %v986_v48, %v702_v51  ;;  %v836_v42 = vpop.permute.xlu1 %835  ;;  %v596_v48 = vsel %vm595_vm5, %v1756_v22, %v475_v45 }
 0x257   : > { %vm837_vm7 = vcmp.eq.s32.totalorder %v836_v42, 1 }
 0x258   : > { %1106 = vtanh.f32 %v703_v54 }
 0x25e   : > { %v1107_v59 = vpop.eup %1106 }
 0x25f   : > { %v706_v60 = vmul.f32 %v1107_v59, %v705_v58 }
 0x261   : > { %v1769_v62 = vadd.f32 %v707_v61, %v706_v60 }
 0x263   : > { %738 = vmatmul.f32.vlgmr.msra.gmra.mxu1 %v1769_v62  ;;  %758 = vmatmul.f32.vlgmr.msra.gmra.mxu2 %v1769_v62  ;;  %v717_v50 = vsel %vm716_vm6, %v1769_v62, %v596_v48 }
 0x264   : > { %778 = vmatmul.f32.vlgmr.msra.gmra.mxu3 %v1769_v62 }
 0x2e0   : > { %v739_v0 = vpop.f32.mrf.mxu1 }
 0x2e1   : > { %v783_v1 = vadd.f32 %v989_v63, %v739_v0 }
 0x2e3   : > { %v992_v2 = vmul.f32 -1.442695, %v783_v1 }
 0x2e5   : > { %1108 = vpow2.f32 %v992_v2 }
 0x2e6   : > { %v759_v4 = vpop.f32.mrf.mxu2 }
 0x2e7   : > { %v803_v5 = vadd.f32 %v990_v3, %v759_v4  ;;  %v779_v26 = vpop.f32.mrf.mxu3 }
 0x2e8   : > { %v782_v34 = vadd.f32 %v1722_v8, %v779_v26 }
 0x2e9   : > { %v993_v6 = vmul.f32 -1.442695, %v803_v5 }
 0x2eb   : > { %v1109_v7 = vpop.eup %1108  ;;  %1110 = vpow2.f32 %v993_v6 }
 0x2ec   : > { %v787_v9 = vadd.f32 1.0, %v1109_v7 }
 0x2ee   : > { %1112 = vrcp.f32 %v787_v9  ;;  %v799_v18 = vand.u32 2147483648, %v787_v9  ;;  %v797_v23 = vand.u32 2147483647, %v787_v9  ;;  %vm793_vm13 = vweird.f32 %v787_v9 }
 0x2f0   : > { %v800_v31 = vor.u32 1.1754944e-38, %v799_v18  ;;  %vm798_vm15 = vcmp.eq.f32.partialorder %v797_v23, 8.507059e+37 }
 0x2f1   : > { %v1111_v10 = vpop.eup %1110 }
 0x2f2   : > { %v807_v11 = vadd.f32 1.0, %v1111_v10 }
 0x2f4   : > { %v1113_v12 = vpop.eup %1112  ;;  %1114 = vrcp.f32 %v807_v11  ;;  %v819_v44 = vand.u32 2147483648, %v807_v11  ;;  %v817_v46 = vand.u32 2147483647, %v807_v11  ;;  %vm813_vm1 = vweird.f32 %v807_v11 }
 0x2f5   : > { %v789_v15 = vmul.f32 %v1113_v12, %v787_v9  ;;  %vm794_vm12 = vweird.f32 %v1113_v12 }
 0x2f6   : > { %vm795_vm14 = vmor %vm793_vm13, %vm794_vm12  ;;  %v820_v25 = vor.u32 1.1754944e-38, %v819_v44  ;;  %vm818_vm3 = vcmp.eq.f32.partialorder %v817_v46, 8.507059e+37 }
 0x2f7   : > { %v790_v16 = vsub.f32 1.0, %v789_v15 }
 0x2f9   : > { %v791_v19 = vmul.f32 %v1113_v12, %v790_v16 }
 0x2fa   : > { %v1115_v24 = vpop.eup %1114 }
 0x2fb   : > { %v809_v27 = vmul.f32 %v1115_v24, %v807_v11  ;;  %v792_v30 = vadd.f32 %v1113_v12, %v791_v19  ;;  %vm814_vm0 = vweird.f32 %v1115_v24 }
 0x2fc   : > { %vm815_vm2 = vmor %vm813_vm1, %vm814_vm0 }
 0x2fd   : > { %v810_v32 = vsub.f32 1.0, %v809_v27  ;;  %v796_v35 = vsel %vm795_vm14, %v1113_v12, %v792_v30 }
 0x2fe   : > { %v801_v40 = vsel %vm798_vm15, %v800_v31, %v796_v35 }
 0x2ff   : > { %v823_v41 = vmul.f32 %v801_v40, %v782_v34  ;;  %v811_v43 = vmul.f32 %v1115_v24, %v810_v32 }
 0x301   : > { %v824_v13 = vadd.f32 %v991_v38, %v823_v41  ;;  %v812_v14 = vadd.f32 %v1115_v24, %v811_v43 }
 0x303   : > { %1116 = vtanh.f32 %v824_v13  ;;  %v816_v21 = vsel %vm815_vm2, %v1115_v24, %v812_v14 }
 0x304   : > { %v821_v8 = vsel %vm818_vm3, %v820_v25, %v816_v21 }
 0x305   : > { %v826_v36 = vsub.f32 1.0, %v821_v8  ;;  %v828_v20 = vmul.f32 %v821_v8, %v1769_v62 }
 0x309   : > { %v1117_v39 = vpop.eup %1116 }
 0x30a   : > { %v827_v28 = vmul.f32 %v1117_v39, %v826_v36 }
 0x30b   : > { %844 = sbr.rel (%p994_p1) target bundleno = 945 (0x3b1), region = 64 }
 0x30c   : > { %v829_v49 = vadd.f32 %v828_v20, %v827_v28 }
 0x30e   : > { %v838_v51 = vsel %vm837_vm7, %v829_v49, %v717_v50  ;;  %839 = vst [vmem:[#allocation2] sm:$0xff] %v829_v49 }
 0x30f   : > { %840 = vst [vmem:[#allocation3] sm:$0xff] %v838_v51 }
 0x310   : > { %v860_v52 = vld [vmem:[#allocation9 + $0x78] sm:$0xff]  ;;  %v859_v53 = vld [vmem:[#allocation9 + $0x70] sm:$0xff]  ;;  %v858_v54 = vld [vmem:[#allocation9 + $0x68] sm:$0xff] }
 0x311   : > { %865 = vmatpush.msra.mxu0 %v860_v52  ;;  %v857_v55 = vld [vmem:[#allocation9 + $0x60] sm:$0xff]  ;;  %v856_v47 = vld [vmem:[#allocation9 + $0x58] sm:$0xff]  ;;  %v855_v22 = vld [vmem:[#allocation9 + $0x50] sm:$0xff] }
 0x312   : > { %v854_v56 = vld [vmem:[#allocation9 + $0x48] sm:$0xff]  ;;  %v853_v57 = vld [vmem:[#allocation9 + $0x40] sm:$0xff]  ;;  %v852_v58 = vld [vmem:[#allocation9 + $0x38] sm:$0xff] }
 0x313   : > { %866 = vmatpush.msra.mxu0 %v859_v53  ;;  %v851_v59 = vld [vmem:[#allocation9 + $0x30] sm:$0xff]  ;;  %v850_v60 = vld [vmem:[#allocation9 + $0x28] sm:$0xff]  ;;  %v849_v61 = vld [vmem:[#allocation9 + $0x20] sm:$0xff] }
 0x314   : > { %v848_v62 = vld [vmem:[#allocation9 + $0x18] sm:$0xff]  ;;  %v847_v63 = vld [vmem:[#allocation9 + $0x10] sm:$0xff]  ;;  %v846_v0 = vld [vmem:[#allocation9 + $0x8] sm:$0xff] }
 0x315   : > { %867 = vmatpush.msra.mxu0 %v858_v54  ;;  %v845_v1 = vld [vmem:[#allocation9] sm:$0xff]  ;;  %v1118_v2 = vld [vmem:[%s1808_s5] ss:$0 sm:$0xff] }
 0x317   : > { %868 = vmatpush.msra.mxu0 %v857_v55 }
 0x319   : > { %869 = vmatpush.msra.mxu0 %v856_v47 }
 0x31b   : > { %870 = vmatpush.msra.mxu0 %v855_v22 }
 0x31d   : > { %871 = vmatpush.msra.mxu0 %v854_v56 }
 0x31f   : > { %872 = vmatpush.msra.mxu0 %v853_v57 }
 0x321   : > { %873 = vmatpush.msra.mxu0 %v852_v58 }
 0x323   : > { %874 = vmatpush.msra.mxu0 %v851_v59 }
 0x325   : > { %875 = vmatpush.msra.mxu0 %v850_v60 }
 0x327   : > { %876 = vmatpush.msra.mxu0 %v849_v61 }
 0x329   : > { %877 = vmatpush.msra.mxu0 %v848_v62 }
 0x32b   : > { %878 = vmatpush.msra.mxu0 %v847_v63 }
 0x32d   : > { %879 = vmatpush.msra.mxu0 %v846_v0 }
 0x32f   : > { %880 = vmatpush.msra.mxu0 %v845_v1 }
 0x330   : > { %881 = vmatmul.f32.vlgmr.msra.gmra.mxu0 %v838_v51 }
 0x3ad   : > { %v882_v3 = vpop.f32.mrf.mxu0 }
 0x3ae   : > { %v883_v4 = vadd.f32 %v1118_v2, %v882_v3 }
 0x3b0   : > { %885 = vst [vmem:[#allocation10] sm:$0xff] %v883_v4 }
 0x3b1 PF: > { %p1032_p4 = scmp.eq.s32.totalorder %s1344_s25, 1  ;;  %s1289_s24 = smov [#allocation10]  }
 0x3b2   : > { %s892_s20 = sshll.u32 %s1289_s24, 4  ;;  %s894_s8 = sshll.u32 %s1809_s6, 4  ;;  %s893_s20 = int_to_ptr.vmem [resolvable:$true] %s892_s20  ;;  %s895_s8 = int_to_ptr.hbm [resolvable:$true] %s894_s8 }
 0x3b3   : > { %1013 = dma.vmem_to_hbm [thread:$0]  (%p1032_p4), %s893_s20, 128, %s895_s8, [#allocation6]  }
 0x3b4   : > { %1262 = dma.done.wait (%p1032_p4), [#allocation6], 128  }
 0x3b5   : > { %1264 = vsyncadd (%p1032_p4), [#allocation6], 4294967168 }
 0x3b6 PF: > { %s1813_s27 = smov %s1384_s21  ;;  %p18_p5 = scmp.ge.s32.totalorder %s1375_s18, 4  }
 0x3b7   : > { %s1814_s21 = smov %s1271_s22  ;;  %s1815_s22 = smov %s1275_s23 }
 0x3b8   : > { %s1816_s23 = smov %s1813_s27  ;;  %s1817_s24 = smov %s1375_s18 }
 0x3b9   :  { %20 = sbr.rel (!%p18_p5) target bundleno = 5 (0x5), region = 100 }
 0x3be   :  { %908 = vsyncpa [#allocation5], 1 }
 0x3bf   :  { %910 = vsyncpa [#allocation5 + $0x1], 1 }
 0x3c0   :  { %911 = vsyncpa [#allocation8], 1 }
 0x3c1   :  { %912 = vsyncpa [#allocation6], 1 }
 0x3c2   :  { %914 = vsyncpa [#allocation6 + $0x1], 1 }

</bundles_post_ra>
